<compile_context>
chip_gen: v6e
topology: v6e:2x2x1
jax: 0.10.0
libtpu: 0.0.40
codegen_flags: <defaults>
</compile_context>

<pallas_src>
import jax
import jax.numpy as jnp
from jax.experimental import pallas as pl
from jax.experimental.pallas import tpu as pltpu


def _round_up(x, m):
    return ((x + m - 1) // m) * m


def _linear_sigmoid_kernel(x_ref, wt_ref, x1_ref, y1_ref):
    # x_ref: (tm, tk) bf16, wt_ref: (tk, tn) bf16 — plain K-major contraction on the MXU.
    # x1_ref / y1_ref: (tm, tn) f32; their block index is constant in k, so x1_ref is
    # VMEM-resident across the reduction and doubles as the f32 accumulator (no scratch).
    k = pl.program_id(2)

    @pl.when(k == 0)
    def _():
        x1_ref[...] = jnp.zeros_like(x1_ref)

    x1_ref[...] += jnp.dot(
        x_ref[...], wt_ref[...], preferred_element_type=jnp.float32
    )

    @pl.when(k == pl.num_programs(2) - 1)
    def _():
        # exp() lowers to the EUP slot; sigmoid finalize only on the last k step.
        y1_ref[...] = jax.nn.sigmoid(x1_ref[...]).astype(y1_ref.dtype)


def prepare_weight(weight, dtype=jnp.bfloat16):
    """One-time (parameter-load-time) prep of the PyTorch nn.Linear weight.

    (C_out, C_in) -> (C_in, C_out), cast to bf16.  Doing the transpose once here means the
    kernel never pays a per-tile transposed-RHS path, and the HBM copy is amortized over
    every forward call.
    """
    return jnp.asarray(weight).T.astype(dtype)


# Keep the whole bf16 weight resident in VMEM when it is at most this big.
_RESIDENT_WEIGHT_BYTES = 8 * 1024 * 1024


def _select_tiles(B, C_in, C_out, in_itemsize):
    w_bytes = C_in * C_out * in_itemsize
    if w_bytes <= _RESIDENT_WEIGHT_BYTES:
        # Weight-resident schedule: full K and N per block, weight DMA'd exactly once.
        tk, tn = C_in, C_out
        if B <= 16:
            tm = B                                   # full-dim block, no batch padding
        elif B <= 512:
            tm = _round_up((B + 1) // 2, 16)         # grid_i >= 2 so v7x megacore has work
        else:
            tm = 256
    else:
        # General tiled fallback (weight too large to keep resident).
        # TODO(synk): for very large ragged C_in, mask the K tail in-kernel instead of
        # padding x (saves one extra HBM pass of the activation).
        tm = min(256, _round_up(B, 16))
        tn = min(512, _round_up(C_out, 128))
        tk = min(512, _round_up(C_in, 128))
    return tm, tn, tk


def simple_layer_forward(x, w_t):
    """x: (B, C_in) float32; w_t: (C_in, C_out) bf16 from prepare_weight().

    Returns [x1, y1] (float32) with x1 = x @ W^T and y1 = sigmoid(x1).
    """
    B, C_in = x.shape
    C_in_w, C_out = w_t.shape
    assert C_in == C_in_w, "w_t must be (C_in, C_out) — run prepare_weight() first"

    in_dtype = w_t.dtype
    in_itemsize = jnp.dtype(in_dtype).itemsize
    x_in = x.astype(in_dtype)  # bf16 stream to the MXU; halves the HBM read of x

    tm, tn, tk = _select_tiles(B, C_in, C_out, in_itemsize)

    Bp = _round_up(B, tm)
    C_out_p = _round_up(C_out, tn)
    C_in_p = _round_up(C_in, tk)

    # Padding is only needed off the weight-resident fast path (or when batch is tiled);
    # zero-padded K columns contribute 0 to the dot, padded rows/cols are sliced off below.
    if (Bp, C_in_p) != (B, C_in):
        x_in = jnp.pad(x_in, ((0, Bp - B), (0, C_in_p - C_in)))
    if (C_in_p, C_out_p) != (C_in, C_out):
        w_t = jnp.pad(w_t, ((0, C_in_p - C_in), (0, C_out_p - C_out)))

    grid = (Bp // tm, C_out_p // tn, C_in_p // tk)

    # VMEM budget: double-buffered bf16 inputs + (resident) f32 output tiles, with
    # headroom, capped below v7x's 64 MiB physical VMEM.
    vmem_est = 2 * tm * tk * in_itemsize + 2 * tk * tn * in_itemsize + 2 * 2 * tm * tn * 4
    vmem_limit = min(max(32 * 1024 * 1024, (vmem_est * 3) // 2), 60 * 1024 * 1024)

    cost = pl.CostEstimate(
        flops=2 * Bp * C_in_p * C_out_p,
        transcendentals=Bp * C_out_p,
        bytes_accessed=(Bp * C_in_p + C_in_p * C_out_p) * in_itemsize
        + 2 * Bp * C_out_p * 4,
    )

    x1p, y1p = pl.pallas_call(
        _linear_sigmoid_kernel,
        out_shape=(
            jax.ShapeDtypeStruct((Bp, C_out_p), jnp.float32),
            jax.ShapeDtypeStruct((Bp, C_out_p), jnp.float32),
        ),
        grid_spec=pltpu.PrefetchScalarGridSpec(
            num_scalar_prefetch=0,
            grid=grid,
            in_specs=[
                pl.BlockSpec((tm, tk), lambda i, j, k: (i, k)),  # x tile
                pl.BlockSpec((tk, tn), lambda i, j, k: (k, j)),  # W^T tile; constant when resident
            ],
            out_specs=(
                pl.BlockSpec((tm, tn), lambda i, j, k: (i, j)),  # x1 (resident over k)
                pl.BlockSpec((tm, tn), lambda i, j, k: (i, j)),  # y1 (resident over k)
            ),
        ),
        compiler_params=pltpu.CompilerParams(
            dimension_semantics=("parallel", "parallel", "arbitrary"),
            vmem_limit_bytes=int(vmem_limit),
        ),
        cost_estimate=cost,
    )(x_in, w_t)

    if (Bp, C_out_p) != (B, C_out):
        x1p = x1p[:B, :C_out]
        y1p = y1p[:B, :C_out]
    return [x1p, y1p]


if __name__ == "__main__":
    key = jax.random.PRNGKey(0)
    k_x, k_w = jax.random.split(key)

    batch = 8
    channel_in = 32
    channel_out = 16

    x0 = jax.random.normal(k_x, (batch, channel_in), dtype=jnp.float32)
    # Deterministic init matching nn.Linear(channel_in, channel_out, bias=False):
    # weight shape (channel_out, channel_in), uniform(-1/sqrt(channel_in), +1/sqrt(channel_in))
    bound = 1.0 / (channel_in ** 0.5)
    weight = jax.random.uniform(
        k_w, (channel_out, channel_in), dtype=jnp.float32, minval=-bound, maxval=bound
    )

    # One-time parameter-load-side prep: transpose to (C_in, C_out) + cast to bf16.
    w_t = prepare_weight(weight)

    x1, y1 = simple_layer_forward(x0, w_t)
    jax.block_until_ready(x1)
    jax.block_until_ready(y1)

    # Sanity check against the plain f32 JAX reference (tolerance loosened for the
    # bf16 MXU operands; accumulation is still f32).
    x1_ref = x0 @ weight.T
    y1_ref = jax.nn.sigmoid(x1_ref)
    assert jnp.allclose(x1, x1_ref, atol=3e-2, rtol=3e-2), "x1 mismatch"
    assert jnp.allclose(y1, y1_ref, atol=1e-2, rtol=1e-2), "y1 mismatch"

    print("KERNEL_OK")
</pallas_src>

<mosaic_0001>
module attributes {stable_mosaic.version = 11 : i64} {
  func.func @_linear_sigmoid_kernel(%arg0: i32, %arg1: i32, %arg2: i32, %arg3: memref<8x32xbf16, #tpu.memory_space<vmem>>, %arg4: memref<32x16xbf16, #tpu.memory_space<vmem>>, %arg5: memref<8x16xf32, #tpu.memory_space<vmem>>, %arg6: memref<8x16xf32, #tpu.memory_space<vmem>>) attributes {dimension_semantics = [#tpu.dimension_semantics<parallel>, #tpu.dimension_semantics<parallel>, #tpu.dimension_semantics<arbitrary>], iteration_bounds = array<i64: 1, 1, 1>, scalar_prefetch = 0 : i64, scratch_operands = 0 : i64, tpu.core_type = #tpu.core_type<tc>, window_params = [{transform_indices = @transform_0, window_bounds = array<i64: 8, 32>}, {transform_indices = @transform_1, window_bounds = array<i64: 32, 16>}, {transform_indices = @transform_2, window_bounds = array<i64: 8, 16>}, {transform_indices = @transform_3, window_bounds = array<i64: 8, 16>}]} {
    %c0_i32 = arith.constant 0 : i32
    %0 = arith.cmpi eq, %arg2, %c0_i32 : i32
    %1 = arith.extui %0 : i1 to i32
    %c0_i32_0 = arith.constant 0 : i32
    %2 = arith.cmpi ne, %1, %c0_i32_0 : i32
    scf.if %2 {
      %cst_10 = arith.constant 0.000000e+00 : f32
      %12 = vector.broadcast %cst_10 : f32 to vector<8x16xf32>
      %c0_11 = arith.constant 0 : index
      %c0_12 = arith.constant 0 : index
      %13 = vector.load %arg5[%c0_11, %c0_12] : memref<8x16xf32, #tpu.memory_space<vmem>>, vector<8x16xf32>
      tpu.vector_store %arg5[%c0_11, %c0_12], %12 {strides = array<i32>} : memref<8x16xf32, #tpu.memory_space<vmem>>, vector<8x16xf32>,
    } else {
    }
    %c0 = arith.constant 0 : index
    %c0_1 = arith.constant 0 : index
    %3 = vector.load %arg5[%c0, %c0_1] : memref<8x16xf32, #tpu.memory_space<vmem>>, vector<8x16xf32>
    %c0_2 = arith.constant 0 : index
    %c0_3 = arith.constant 0 : index
    %4 = vector.load %arg3[%c0_2, %c0_3] : memref<8x32xbf16, #tpu.memory_space<vmem>>, vector<8x32xbf16>
    %c0_4 = arith.constant 0 : index
    %c0_5 = arith.constant 0 : index
    %5 = vector.load %arg4[%c0_4, %c0_5] : memref<32x16xbf16, #tpu.memory_space<vmem>>, vector<32x16xbf16>
    %cst = arith.constant dense<0.000000e+00> : vector<8x16xf32>
    %6 = tpu.matmul %4, %5, %cst {dimension_numbers = #tpu.dot_dimension_numbers<[1], [0], [0], [1], [0, 0, 1, 1], [], []>} : vector<8x32xbf16>, vector<32x16xbf16>, vector<8x16xf32> -> vector<8x16xf32>
    %7 = arith.addf %3, %6 : vector<8x16xf32>
    %c0_6 = arith.constant 0 : index
    %c0_7 = arith.constant 0 : index
    %8 = vector.load %arg5[%c0_6, %c0_7] : memref<8x16xf32, #tpu.memory_space<vmem>>, vector<8x16xf32>
    tpu.vector_store %arg5[%c0_6, %c0_7], %7 {strides = array<i32>} : memref<8x16xf32, #tpu.memory_space<vmem>>, vector<8x16xf32>,
    %c0_i32_8 = arith.constant 0 : i32
    %9 = arith.cmpi eq, %arg2, %c0_i32_8 : i32
    %10 = arith.extui %9 : i1 to i32
    %c0_i32_9 = arith.constant 0 : i32
    %11 = arith.cmpi ne, %10, %c0_i32_9 : i32
    scf.if %11 {
      %c0_10 = arith.constant 0 : index
      %c0_11 = arith.constant 0 : index
      %12 = vector.load %arg5[%c0_10, %c0_11] : memref<8x16xf32, #tpu.memory_space<vmem>>, vector<8x16xf32>
      %13 = arith.negf %12 : vector<8x16xf32>
      %14 = math.exp %13 : vector<8x16xf32>
      %cst_12 = arith.constant 1.000000e+00 : f32
      %15 = vector.broadcast %cst_12 : f32 to vector<8x16xf32>
      %16 = arith.addf %15, %14 : vector<8x16xf32>
      %17 = arith.divf %15, %16 : vector<8x16xf32>
      %c0_13 = arith.constant 0 : index
      %c0_14 = arith.constant 0 : index
      %18 = vector.load %arg6[%c0_13, %c0_14] : memref<8x16xf32, #tpu.memory_space<vmem>>, vector<8x16xf32>
      tpu.vector_store %arg6[%c0_13, %c0_14], %17 {strides = array<i32>} : memref<8x16xf32, #tpu.memory_space<vmem>>, vector<8x16xf32>,
    } else {
    }
    return
  }
  func.func @transform_0(%arg0: i32, %arg1: i32, %arg2: i32) -> (i32, i32) {
    %c0_i32 = arith.constant 0 : i32
    return %arg0, %arg2 : i32, i32
  }
  func.func @transform_1(%arg0: i32, %arg1: i32, %arg2: i32) -> (i32, i32) {
    %c0_i32 = arith.constant 0 : i32
    return %arg2, %arg1 : i32, i32
  }
  func.func @transform_2(%arg0: i32, %arg1: i32, %arg2: i32) -> (i32, i32) {
    %c0_i32 = arith.constant 0 : i32
    return %arg0, %arg1 : i32, i32
  }
  func.func @transform_3(%arg0: i32, %arg1: i32, %arg2: i32) -> (i32, i32) {
    %c0_i32 = arith.constant 0 : i32
    return %arg0, %arg1 : i32, i32
  }
}

</mosaic_0001>

<bundles_post_ra>
// kernel: tpu_custom_call.1
= control target key start
LH: loop header
LB: loop body
LE: loop exit
PB: predicated region body
PF: predicated region fallthrough
CT: control target
= control target key end

     0   :  { %9 = vsyncpa [#allocation3], 0  ;;  %vm20_vm0 = vcmask 130048   ;;  %v195_v0 = vmov 0.0   ;;  %vm196_vm1 = vmmov 0   ;;  %s237_s0 = inlined_call_operand.vmem [shape: bf16[8,32], index: 0, kind: input, shape index: {}]   ;;  %s238_s1 = inlined_call_operand.vmem [shape: bf16[32,16], index: 1, kind: input, shape index: {}]   ;;  %s239_s2 = inlined_call_operand.hbm [shape: f32[8,16], index: 2, kind: output, shape index: {0}]   ;;  %s240_s3 = inlined_call_operand.hbm [shape: f32[8,16], index: 3, kind: output, shape index: {1}]  }
   0x1   :  { %21 = vst.msk [vmem:[#allocation2] sm:$0xff] %vm20_vm0, %v195_v0  ;;  %133 = vmatprep.subr.bf16.mxu0 %v195_v0  ;;  %v145_v1 = vld [vmem:[%s238_s1 + $0x8] sm:$0xff]   ;;  %137 = vmatprep.mubr.msk.bf16.mxu0 %vm196_vm1, %v195_v0 }
   0x2   :  { %10 = vsyncpa [#allocation5], 0  ;;  %134 = vmatpush3.bf16.msra.mxu0 %v145_v1  ;;  %v146_v2 = vld [vmem:[%s238_s1] sm:$0xff]   ;;  %vm40_vm2 = vcmask 261120   ;;  %s197_s18 = smov [#allocation2]  }
   0x3   :  { %135 = vmatprep.subr.bf16.mxu0 %v195_v0  ;;  %v23_v3 = vld [vmem:[%s237_s0] sm:$0xf]  ;;  %s104_s19 = sshll.u32 %s197_s18, 4  ;;  %s105_s19 = int_to_ptr.vmem [resolvable:$true] %s104_s19 }
   0x4   :  { %s151_s20 = scalar_lea.vmem %s105_s19, 128  ;;  %p156_p1 = scmp.lt.s32.totalorder %s105_s19, %s105_s19 }
   0x5   :  { %p152_p0 = scmp.ne.s32.totalorder %s105_s19, %s151_s20  ;;  %p157_p2 = scmp.lt.s32.totalorder %s151_s20, %s151_s20 }
   0x6   :  { %136 = vmatpush3.bf16.msra.mxu0 %v146_v2 }
   0x7   :  { %p158_p3 = por %p157_p2, %p156_p1 }
   0x8   :  { %v22_v4 = vld [vmem:[#allocation2] sm:$0xff] }
   0x9   :  { %138 = vmatmul.mubr.msk.bf16.vlgmr.msra.gmra.mxu0 %vm40_vm2, %v23_v3  ;;  %p159_p4 = pnand %p158_p3, %p152_p0 }
  0xc9   :  { %v78_v5 = vpop.f32.mrf.mxu0 }
  0xca   :  { %v84_v6 = vadd.f32 %v78_v5, %v22_v4 }
  0xcb   :  { %v139_v7 = vpop.f32.mrf.mxu0 }
  0xcc   :  { %86 = vst.msk [vmem:[#allocation2] sm:$0xff] %vm20_vm0, %v84_v6 }
  0xcd   :  { %v81_v8 = vpop.f32.mrf.mxu0 }
  0xce   :  { %162 = shalt.err (!%p159_p4)
}
  0xcf   :  { %107 = dma.vmem_to_hbm [thread:$0]  %s105_s19, 128, %s239_s2, [#allocation3]   ;;  %v140_v9 = vpop.f32.mrf.mxu0 }
  0xd0   :  { %s198_s21 = smov [#allocation4]  }
  0xd1   :  { %s114_s22 = sshll.u32 %s198_s21, 4  ;;  %s115_s22 = int_to_ptr.vmem [resolvable:$true] %s114_s22 }
  0xd2   :  { %s171_s23 = scalar_lea.vmem %s115_s22, 128  ;;  %p176_p6 = scmp.lt.s32.totalorder %s115_s22, %s115_s22 }
  0xd3   :  { %v90_v10 = vld [vmem:[#allocation2] sm:$0xff]  ;;  %p172_p5 = scmp.ne.s32.totalorder %s115_s22, %s171_s23  ;;  %p177_p7 = scmp.lt.s32.totalorder %s171_s23, %s171_s23 }
  0xd4   :  { %v129_v11 = vmul.f32 -1.442695, %v90_v10 }
  0xd5   :  { %p178_p8 = por %p177_p7, %p176_p6 }
  0xd6   :  { %147 = vpow2.f32 %v129_v11 }
  0xd7   :  { %p179_p9 = pnand %p178_p8, %p172_p5 }
  0xe3   :  { %v148_v12 = vpop.eup %147 }
  0xe4   :  { %v94_v13 = vadd.f32 1.0, %v148_v12 }
  0xe6   :  { %149 = vrcp.f32 %v94_v13 }
  0xf3   :  { %v150_v14 = vpop.eup %149 }
  0xf4   :  { %97 = vst.msk [vmem:[#allocation4] sm:$0xff] %vm20_vm0, %v150_v14 }
  0xf5   :  { %182 = shalt.err (!%p179_p9)
}
  0xf6   :  { %117 = dma.vmem_to_hbm [thread:$0]  %s115_s22, 128, %s240_s3, [#allocation5]  }
  0xf7   :  { %191 = dma.done.wait [#allocation3], 128  }
  0xf8   :  { %192 = vsyncadd [#allocation3], 4294967168 }
  0xf9   :  { %193 = dma.done.wait [#allocation5], 128  }
  0xfa   :  { %194 = vsyncadd [#allocation5], 4294967168 }
  0xfb   :  { %124 = vsyncpa [#allocation3], 1 }
  0xfc   :  { %125 = vsyncpa [#allocation5], 1 }

</bundles_post_ra>
